<compile_context>
chip_gen: v5e
topology: v5e:2x2
jax: 0.10.0
libtpu: 0.0.40
codegen_flags: <defaults>
</compile_context>

<pallas_src>
import math
from functools import partial

import jax
import jax.numpy as jnp
from jax import lax
from jax.experimental import pallas as pl
from jax.experimental.pallas import tpu as pltpu


# ------------------------------- kernels -------------------------------------

_QK_DIMS = (((2,), (2,)), ((0,), (0,)))   # contract d_k; batch on dim 0
_PV_DIMS = (((2,), (1,)), ((0,), (0,)))   # contract kv;  batch on dim 0


def _mask_scores(s, m_ref):
    # nonzero == masked -> -1e12 (matches torch.masked_fill_); the mask block
    # may carry broadcast (size-1) batch / query / key dims.
    return jnp.where(m_ref[...] != 0, jnp.float32(-1e12), s)


def _sdpa_onepass_kernel(*refs, scale, has_mask):
    """Whole KV range in one tile: plain softmax, no online-softmax machinery."""
    if has_mask:
        q_ref, k_ref, v_ref, m_ref, o_ref = refs
    else:
        q_ref, k_ref, v_ref, o_ref = refs
        m_ref = None

    # Contract the last dims directly (no materialized K^T relayout; Mosaic
    # feeds the transposed RHS to the MXU -- same pattern as the production
    # flash-attention kernel).  fp32 accumulation; scale applied in fp32.
    s = lax.dot_general(q_ref[...], k_ref[...], _QK_DIMS,
                        preferred_element_type=jnp.float32) * scale
    if m_ref is not None:
        s = _mask_scores(s, m_ref)

    m = jnp.max(s, axis=-1, keepdims=True)
    p = jnp.exp(s - m)
    l = jnp.sum(p, axis=-1, keepdims=True)
    pv = lax.dot_general(p.astype(v_ref.dtype), v_ref[...], _PV_DIMS,
                         preferred_element_type=jnp.float32)
    o_ref[...] = (pv * pl.reciprocal(l, approx=False)).astype(o_ref.dtype)


def _sdpa_online_kernel(*refs, scale, has_mask):
    """Flash-style online softmax over the kv grid axis; accumulates directly
    into the fp32 output block (resident across the kv axis)."""
    if has_mask:
        q_ref, k_ref, v_ref, m_ref, o_ref, m_scr, l_scr = refs
    else:
        q_ref, k_ref, v_ref, o_ref, m_scr, l_scr = refs
        m_ref = None

    kv = pl.program_id(2)

    @pl.when(kv == 0)
    def _init():
        m_scr[...] = jnp.full_like(m_scr, -jnp.inf)
        l_scr[...] = jnp.zeros_like(l_scr)
        o_ref[...] = jnp.zeros_like(o_ref)

    s = lax.dot_general(q_ref[...], k_ref[...], _QK_DIMS,
                        preferred_element_type=jnp.float32) * scale
    if m_ref is not None:
        s = _mask_scores(s, m_ref)

    m_prev = m_scr[...]                                        # (bt, tq, 1)
    m_new = jnp.maximum(m_prev, jnp.max(s, axis=-1, keepdims=True))
    alpha = jnp.exp(m_prev - m_new)
    p = jnp.exp(s - m_new)                                     # (bt, tq, tk)

    l_scr[...] = alpha * l_scr[...] + jnp.sum(p, axis=-1, keepdims=True)
    pv = lax.dot_general(p.astype(v_ref.dtype), v_ref[...], _PV_DIMS,
                         preferred_element_type=jnp.float32)
    o_ref[...] = alpha * o_ref[...] + pv                       # fp32 out block
    m_scr[...] = m_new

    @pl.when(kv == pl.num_programs(2) - 1)
    def _finalize():
        o_ref[...] = o_ref[...] * pl.reciprocal(l_scr[...], approx=False)


# ------------------------------ tiling policy --------------------------------

def _pick_tiles(B, n):
    # kv tile: as wide as possible (lane-dense scores, fewer online steps).
    tk = n
    for t in (512, 256, 128):
        if n % t == 0:
            tk = t
            break
    # q tile: asymmetric (<= 256) -- halves the per-step fp32 score/prob
    # working set and exp count (vst/EUP pressure on v5e) at no DMA cost.
    tq = n
    for t in (256, 128):
        if n % t == 0:
            tq = t
            break
    # Fold small-sequence batches into one grid step (amortize ~0.35us/step).
    bt = 1
    if n < 128:
        tq = tk = n
        cap = max(1, (128 * 128) // max(n * n, 1))
        for d in range(min(B, cap), 0, -1):
            if B % d == 0:
                bt = d
                break
    # v7x has 2 TensorCores: guarantee >= 2 "parallel" grid steps when we can.
    while ((B // bt) * (n // tq) < 2 and tq >= 256 and tq % 2 == 0
           and (tq // 2) % 8 == 0 and n % (tq // 2) == 0):
        tq //= 2
    return bt, tq, tk


def _mask_index_map_2d(bflag, qflag):
    def imap(bi, qi):
        return (bi if bflag else 0, qi if qflag else 0, 0)
    return imap


def _mask_index_map_3d(bflag, qflag, kflag):
    def imap(bi, qi, ki):
        return (bi if bflag else 0, qi if qflag else 0, ki if kflag else 0)
    return imap


# -------------------------------- wrappers ------------------------------------

def _xla_sdpa(Q, K, V, mask=None):
    d_k = K.shape[-1]
    score = jnp.einsum("...nd,...md->...nm",
                       Q.astype(jnp.float32), K.astype(jnp.float32)) / math.sqrt(d_k)
    if mask is not None:
        score = jnp.where(mask, jnp.float32(-1e12), score)
    score = jax.nn.softmax(score, axis=-1)
    return jnp.einsum("...nm,...md->...nd", score, V.astype(jnp.float32))


_reference = _xla_sdpa


def scaled_dot_product_attention(Q, K, V, mask=None):
    """Q, K: (*, n, d_k); V: (*, n, d_v); mask broadcastable to (*, n, n),
    True/nonzero == masked, or None.  Returns fp32 of shape (*, n, d_v)."""
    *lead, n, d_k = Q.shape
    d_v = V.shape[-1]
    B = 1
    for s in lead:
        B *= int(s)
    B = max(B, 1)

    # Tiny sequences: even batch-folded, the per-head matmuls are ~8x32 and the
    # MXU sits at a few percent utilization -- XLA's fused path wins here.
    if n < 64:
        return _xla_sdpa(Q, K, V, mask)

    Qf = Q.reshape(B, n, d_k)
    Kf = K.reshape(B, n, d_k)
    Vf = V.reshape(B, n, d_v)

    bt, tq, tk = _pick_tiles(B, n)
    kv_steps = n // tk
    scale = 1.0 / math.sqrt(d_k)

    has_mask = mask is not None
    if has_mask:
        mlead = mask.shape[:-2]
        mq, mk = int(mask.shape[-2]), int(mask.shape[-1])
        if all(int(d) == 1 for d in mlead):
            # Shared mask: keep ONE int8 copy; the BlockSpec index_map returns
            # 0 on the batch axis (no (B, n, n) materialization / duplicated DMA).
            Mf = mask.reshape(1, mq, mk).astype(jnp.int8)
            Bm = 1
        else:
            Mf = jnp.broadcast_to(mask, (*lead, mq, mk)).reshape(B, mq, mk)
            Mf = Mf.astype(jnp.int8)          # int8: 4x less HBM than fp32
            Bm = B
        bflag, qflag, kflag = (Bm == B), (mq == n), (mk == n)
        mb_blk = bt if bflag else 1
        mq_blk = tq if qflag else 1
        mk_blk = tk if kflag else 1

    if kv_steps == 1:
        # ---------- single-pass kernel: whole KV range in one tile -----------
        grid = (B // bt, n // tq)
        in_specs = [
            pl.BlockSpec((bt, tq, d_k), lambda bi, qi: (bi, qi, 0)),
            pl.BlockSpec((bt, tk, d_k), lambda bi, qi: (bi, 0, 0)),
            pl.BlockSpec((bt, tk, d_v), lambda bi, qi: (bi, 0, 0)),
        ]
        args = [Qf, Kf, Vf]
        if has_mask:
            in_specs.append(pl.BlockSpec((mb_blk, mq_blk, mk_blk),
                                         _mask_index_map_2d(bflag, qflag)))
            args.append(Mf)
        out_specs = pl.BlockSpec((bt, tq, d_v), lambda bi, qi: (bi, qi, 0))
        scratch = []
        kernel = partial(_sdpa_onepass_kernel, scale=scale, has_mask=has_mask)
        dims = ("parallel", "parallel")
    else:
        # ---------- flash-style online softmax over the kv axis --------------
        # TODO(synk): on v5e, pl.Buffered(3) on the K/V/mask specs can hide one
        # extra DMA latency if the kv stream is exposed (cheap in 128 MiB VMEM).
        grid = (B // bt, n // tq, kv_steps)
        in_specs = [
            pl.BlockSpec((bt, tq, d_k), lambda bi, qi, ki: (bi, qi, 0)),
            pl.BlockSpec((bt, tk, d_k), lambda bi, qi, ki: (bi, ki, 0)),
            pl.BlockSpec((bt, tk, d_v), lambda bi, qi, ki: (bi, ki, 0)),
        ]
        args = [Qf, Kf, Vf]
        if has_mask:
            in_specs.append(pl.BlockSpec((mb_blk, mq_blk, mk_blk),
                                         _mask_index_map_3d(bflag, qflag, kflag)))
            args.append(Mf)
        out_specs = pl.BlockSpec((bt, tq, d_v), lambda bi, qi, ki: (bi, qi, 0))
        scratch = [
            pltpu.VMEM((bt, tq, 1), jnp.float32),   # running max
            pltpu.VMEM((bt, tq, 1), jnp.float32),   # running sum
        ]
        kernel = partial(_sdpa_online_kernel, scale=scale, has_mask=has_mask)
        dims = ("parallel", "parallel", "arbitrary")

    # VMEM budget from the actual (double-buffered) tiles + score/prob
    # temporaries, capped at ~81% of this generation's physical VMEM
    # (v7x: ~52 MiB, v5e/v6e: ~104 MiB) so Mosaic keeps internal headroom.
    ib = jnp.dtype(Q.dtype).itemsize
    est = 2 * bt * (tq * d_k + tk * d_k + tk * d_v) * ib       # input tiles x2 bufs
    est += 2 * bt * tq * d_v * 4                               # fp32 output block
    if has_mask:
        est += 2 * mb_blk * mq_blk * mk_blk                    # int8 mask block
    est += 2 * bt * tq * 4                                     # m/l scratch
    est += 6 * bt * tq * tk * 4                                # score/prob temps
    phys = 64 * 1024 * 1024
    try:
        phys = int(pltpu.get_tpu_info().vmem_capacity_bytes)
    except Exception:
        pass
    cap = (phys // 16) * 13
    vmem_limit = int(min(max(2 * est, 32 * 1024 * 1024), cap))

    out = pl.pallas_call(
        kernel,
        out_shape=jax.ShapeDtypeStruct((B, n, d_v), jnp.float32),
        grid_spec=pltpu.PrefetchScalarGridSpec(
            num_scalar_prefetch=0,
            grid=grid,
            in_specs=in_specs,
            out_specs=out_specs,
            scratch_shapes=scratch,
        ),
        compiler_params=pltpu.CompilerParams(
            dimension_semantics=dims,
            vmem_limit_bytes=vmem_limit,
        ),
    )(*args)

    # TODO(synk): for d_v < 128 the final HBM store is lane-masked; a
    # multi-head caller should fold 128//d_v heads into the lane axis (or pack
    # two heads per grid step) for unmasked stores and better PV MXU fill.
    return out.reshape(*lead, n, d_v)


# ---------------------------------- demo --------------------------------------

if __name__ == "__main__":
    key = jax.random.PRNGKey(0)
    k1, k2, k3, k4 = jax.random.split(key, 4)

    # --- single-pass kernel (kv fits one tile), full per-batch mask ----------
    B, n, d_k, d_v = 2, 128, 64, 64
    Q = jax.random.normal(k1, (B, n, d_k), dtype=jnp.float32)
    K = jax.random.normal(k2, (B, n, d_k), dtype=jnp.float32)
    V = jax.random.normal(k3, (B, n, d_v), dtype=jnp.float32)
    mask = jax.random.bernoulli(k4, p=0.2, shape=(B, n, n))

    out = jax.block_until_ready(scaled_dot_product_attention(Q, K, V, mask))
    assert out.shape == (B, n, d_v) and out.dtype == jnp.float32
    assert jnp.allclose(out, _reference(Q, K, V, mask), atol=2e-5, rtol=2e-5), \
        "mismatch vs reference (masked, single-pass)"

    # --- batch-broadcast mask: one (1, n, n) copy streamed, no duplication ---
    bmask = jax.random.bernoulli(k4, p=0.3, shape=(1, n, n))
    out_b = jax.block_until_ready(scaled_dot_product_attention(Q, K, V, bmask))
    assert jnp.allclose(out_b, _reference(Q, K, V, bmask), atol=2e-5, rtol=2e-5), \
        "mismatch vs reference (broadcast mask)"

    # --- padding-style mask (B, 1, n), broadcast over the query dim ----------
    pmask = jax.random.bernoulli(k4, p=0.3, shape=(B, 1, n))
    out_p = jax.block_until_ready(scaled_dot_product_attention(Q, K, V, pmask))
    assert jnp.allclose(out_p, _reference(Q, K, V, pmask), atol=2e-5, rtol=2e-5), \
        "mismatch vs reference (padding mask)"

    # --- mask=None path (separate kernel, no mask DMA at all) ----------------
    out_n = jax.block_until_ready(scaled_dot_product_attention(Q, K, V, None))
    assert jnp.allclose(out_n, _reference(Q, K, V, None), atol=2e-5, rtol=2e-5), \
        "mismatch vs reference (no mask)"

    # --- online-softmax path (multiple kv steps), 4-D leading dims -----------
    B2, H2, n2, d2 = 1, 2, 384, 64
    q2 = jax.random.normal(k1, (B2, H2, n2, d2), dtype=jnp.float32)
    k2a = jax.random.normal(k2, (B2, H2, n2, d2), dtype=jnp.float32)
    v2 = jax.random.normal(k3, (B2, H2, n2, d2), dtype=jnp.float32)
    m2 = jax.random.bernoulli(k4, p=0.3, shape=(1, 1, n2, n2))
    out2 = jax.block_until_ready(scaled_dot_product_attention(q2, k2a, v2, m2))
    assert jnp.allclose(out2, _reference(q2, k2a, v2, m2), atol=5e-5, rtol=5e-5), \
        "mismatch vs reference (online softmax)"

    # --- tiny-n shapes routed to XLA (MXU cannot be filled at 8x32) ----------
    q3 = jax.random.normal(k1, (2, 8, 32), dtype=jnp.float32)
    k3a = jax.random.normal(k2, (2, 8, 32), dtype=jnp.float32)
    v3 = jax.random.normal(k3, (2, 8, 32), dtype=jnp.float32)
    m3 = jax.random.bernoulli(k4, p=0.2, shape=(2, 8, 8))
    out3 = jax.block_until_ready(scaled_dot_product_attention(q3, k3a, v3, m3))
    assert out3.shape == (2, 8, 32) and bool(jnp.all(jnp.isfinite(out3)))

    print("KERNEL_OK")
</pallas_src>

<mosaic_0001>
module attributes {stable_mosaic.version = 11 : i64} {
  func.func @_sdpa_onepass_kernel(%arg0: i32, %arg1: i32, %arg2: memref<1x128x64xf32, #tpu.memory_space<vmem>>, %arg3: memref<1x128x64xf32, #tpu.memory_space<vmem>>, %arg4: memref<1x128x64xf32, #tpu.memory_space<vmem>>, %arg5: memref<1x128x128xi8, #tpu.memory_space<vmem>>, %arg6: memref<1x128x64xf32, #tpu.memory_space<vmem>>) attributes {dimension_semantics = [#tpu.dimension_semantics<parallel>, #tpu.dimension_semantics<parallel>], iteration_bounds = array<i64: 2, 1>, scalar_prefetch = 0 : i64, scratch_operands = 0 : i64, tpu.core_type = #tpu.core_type<tc>, window_params = [{transform_indices = @transform_0, window_bounds = array<i64: 1, 128, 64>}, {transform_indices = @transform_1, window_bounds = array<i64: 1, 128, 64>}, {transform_indices = @transform_2, window_bounds = array<i64: 1, 128, 64>}, {transform_indices = @transform_3, window_bounds = array<i64: 1, 128, 128>}, {transform_indices = @transform_4, window_bounds = array<i64: 1, 128, 64>}]} {
    %c0 = arith.constant 0 : index
    %c0_0 = arith.constant 0 : index
    %c0_1 = arith.constant 0 : index
    %0 = vector.load %arg2[%c0, %c0_0, %c0_1] : memref<1x128x64xf32, #tpu.memory_space<vmem>>, vector<1x128x64xf32>
    %c0_2 = arith.constant 0 : index
    %c0_3 = arith.constant 0 : index
    %c0_4 = arith.constant 0 : index
    %1 = vector.load %arg3[%c0_2, %c0_3, %c0_4] : memref<1x128x64xf32, #tpu.memory_space<vmem>>, vector<1x128x64xf32>
    %cst = arith.constant dense<0.000000e+00> : vector<1x128x128xf32>
    %2 = tpu.matmul %0, %1, %cst {dimension_numbers = #tpu.dot_dimension_numbers<[2], [2], [1], [1], [0, 0, 0, 1, 1, 1], [0], [0]>} : vector<1x128x64xf32>, vector<1x128x64xf32>, vector<1x128x128xf32> -> vector<1x128x128xf32>
    %cst_5 = arith.constant 1.250000e-01 : f32
    %3 = vector.broadcast %cst_5 : f32 to vector<1x128x128xf32>
    %4 = arith.mulf %2, %3 : vector<1x128x128xf32>
    %c0_6 = arith.constant 0 : index
    %c0_7 = arith.constant 0 : index
    %c0_8 = arith.constant 0 : index
    %5 = vector.load %arg5[%c0_6, %c0_7, %c0_8] : memref<1x128x128xi8, #tpu.memory_space<vmem>>, vector<1x128x128xi8>
    %c0_i8 = arith.constant 0 : i8
    %6 = vector.broadcast %c0_i8 : i8 to vector<1x128x128xi8>
    %7 = arith.cmpi ne, %5, %6 : vector<1x128x128xi8>
    %cst_9 = arith.constant -9.99999995E+11 : f32
    %8 = vector.broadcast %cst_9 : f32 to vector<1x128x128xf32>
    %9 = arith.select %7, %8, %4 : vector<1x128x128xi1>, vector<1x128x128xf32>
    %cst_10 = arith.constant dense<0xFF800000> : vector<1x128xf32>
    %10 = vector.multi_reduction <maximumf>, %9, %cst_10 [2] : vector<1x128x128xf32> to vector<1x128xf32>
    %11 = vector.shape_cast %10 : vector<1x128xf32> to vector<1x128x1xf32>
    %12 = vector.broadcast %11 : vector<1x128x1xf32> to vector<1x128x128xf32>
    %13 = arith.subf %9, %12 : vector<1x128x128xf32>
    %14 = math.exp %13 : vector<1x128x128xf32>
    %cst_11 = arith.constant dense<0.000000e+00> : vector<1x128xf32>
    %15 = vector.multi_reduction <add>, %14, %cst_11 [2] : vector<1x128x128xf32> to vector<1x128xf32>
    %16 = vector.shape_cast %15 : vector<1x128xf32> to vector<1x128x1xf32>
    %c0_12 = arith.constant 0 : index
    %c0_13 = arith.constant 0 : index
    %c0_14 = arith.constant 0 : index
    %17 = vector.load %arg4[%c0_12, %c0_13, %c0_14] : memref<1x128x64xf32, #tpu.memory_space<vmem>>, vector<1x128x64xf32>
    %cst_15 = arith.constant dense<0.000000e+00> : vector<1x128x64xf32>
    %18 = tpu.matmul %14, %17, %cst_15 {dimension_numbers = #tpu.dot_dimension_numbers<[2], [1], [1], [2], [0, 0, 0, 1, 1, 2], [0], [0]>} : vector<1x128x128xf32>, vector<1x128x64xf32>, vector<1x128x64xf32> -> vector<1x128x64xf32>
    %19 = tpu.reciprocal %16 : vector<1x128x1xf32> -> vector<1x128x1xf32>
    %20 = vector.broadcast %19 : vector<1x128x1xf32> to vector<1x128x64xf32>
    %21 = arith.mulf %18, %20 : vector<1x128x64xf32>
    %c0_16 = arith.constant 0 : index
    %c0_17 = arith.constant 0 : index
    %c0_18 = arith.constant 0 : index
    %22 = vector.load %arg6[%c0_16, %c0_17, %c0_18] : memref<1x128x64xf32, #tpu.memory_space<vmem>>, vector<1x128x64xf32>
    tpu.vector_store %arg6[%c0_16, %c0_17, %c0_18], %21 {strides = array<i32>} : memref<1x128x64xf32, #tpu.memory_space<vmem>>, vector<1x128x64xf32>,
    return
  }
  func.func @transform_0(%arg0: i32, %arg1: i32) -> (i32, i32, i32) {
    %c0_i32 = arith.constant 0 : i32
    %c0_i32_0 = arith.constant 0 : i32
    return %arg0, %arg1, %c0_i32 : i32, i32, i32
  }
  func.func @transform_1(%arg0: i32, %arg1: i32) -> (i32, i32, i32) {
    %c0_i32 = arith.constant 0 : i32
    %c0_i32_0 = arith.constant 0 : i32
    %c0_i32_1 = arith.constant 0 : i32
    return %arg0, %c0_i32, %c0_i32_0 : i32, i32, i32
  }
  func.func @transform_2(%arg0: i32, %arg1: i32) -> (i32, i32, i32) {
    %c0_i32 = arith.constant 0 : i32
    %c0_i32_0 = arith.constant 0 : i32
    %c0_i32_1 = arith.constant 0 : i32
    return %arg0, %c0_i32, %c0_i32_0 : i32, i32, i32
  }
  func.func @transform_3(%arg0: i32, %arg1: i32) -> (i32, i32, i32) {
    %c0_i32 = arith.constant 0 : i32
    %c0_i32_0 = arith.constant 0 : i32
    return %arg0, %arg1, %c0_i32 : i32, i32, i32
  }
  func.func @transform_4(%arg0: i32, %arg1: i32) -> (i32, i32, i32) {
    %c0_i32 = arith.constant 0 : i32
    %c0_i32_0 = arith.constant 0 : i32
    return %arg0, %arg1, %c0_i32 : i32, i32, i32
  }
}

</mosaic_0001>

<bundles_post_ra>
// kernel: tpu_custom_call.1
= control target key start
LH: loop header
LB: loop body
LE: loop exit
PB: predicated region body
PF: predicated region fallthrough
CT: control target
= control target key end

     0   :  { %s1500_s15 = smov 0   ;;  %s1502_s16 = smov 0   ;;  %s2044_s0 = inlined_call_operand.vmem [shape: f32[2,128,64], index: 0, kind: input, shape index: {}]   ;;  %s2045_s1 = inlined_call_operand.vmem [shape: f32[2,128,64], index: 1, kind: input, shape index: {}]   ;;  %s2046_s2 = inlined_call_operand.vmem [shape: f32[2,128,64], index: 2, kind: input, shape index: {}]   ;;  %s2047_s3 = inlined_call_operand.vmem [shape: s8[2,128,128], index: 3, kind: input, shape index: {}]   ;;  %s2048_s4 = inlined_call_operand.vmem [shape: f32[2,128,64], index: 4, kind: output, shape index: {}]  }
   0x1   :  { %s1504_s17 = smov 0  }
   0x2 LB: > { %s26_s18 = sadd.s32 1, %s1468_s16  ;;  %p1247_p0 = scmp.ge.s32.totalorder %s1472_s17, 1  ;;  %s1472_s17 = sphi %s1504_s17, %s14_s17   ;;  %s1468_s16 = sphi %s1502_s16, %s2070_s16   ;;  %s1464_s15 = sphi %s1500_s15, %s2069_s15  }
   0x3   : > { %p28_p1 = scmp.ge.s32.totalorder %s26_s18, 2  ;;  %p220_p2 = scmp.lt.s32.totalorder %s1472_s17, 3 }
   0x5   : > { %s2072_s18 = smov (%p28_p1, %s26_s18), 0  ;;  %p221_p3 = pnand %p1247_p0, %p220_p2 }
   0x6   : > { %p274_p4 = scmp.lt.s32.totalorder (!%p221_p3), %s1464_s15, 1 }
   0x7   : > { %224 = sbr.rel (%p221_p3) target bundleno = 566 (0x236), region = 36 }
   0xc   : > { %s2074_s15 = smov (!%p274_p4, %s1464_s15), 1  ;;  %vm347_vm0 = vcmask 523264   ;;  %v1474_v34 = vmov 0  }
   0xd   : > { %s1521_s19 = sshll.u32 %s2074_s15, 7  ;;  %s1295_s26 = sshll.u32 %s2074_s15, 5 }
   0xe   : > { %s1527_s22 = scalar_lea.vmem %s2045_s1, %s1521_s19  ;;  %s1593_s25 = scalar_lea.vmem %s2044_s0, %s1521_s19 }
   0xf   : > { %v346_v0 = vld [vmem:[%s1527_s22 + $0x78] sm:$0xff]  ;;  %v345_v1 = vld [vmem:[%s1527_s22 + $0x70] sm:$0xff]  ;;  %v344_v2 = vld [vmem:[%s1527_s22 + $0x68] sm:$0xff]  ;;  %s301_s29 = scalar_lea.vmem %s2047_s3, %s1295_s26  ;;  %s1690_s6 = scalar_lea.vmem %s2046_s2, %s1521_s19 }
  0x10   : > { %1258 = vmatpush.xpose.msk.msra.mxu0 %vm347_vm0, %v346_v0  ;;  %1297 = vmatpush.xpose.msk.msra.mxu2 %vm347_vm0, %v346_v0  ;;  %v343_v3 = vld [vmem:[%s1527_s22 + $0x60] sm:$0xff]  ;;  %v342_v4 = vld [vmem:[%s1527_s22 + $0x58] sm:$0xff]  ;;  %v341_v5 = vld [vmem:[%s1527_s22 + $0x50] sm:$0xff]  ;;  %s1818_s9 = scalar_lea.vmem %s2048_s4, %s1521_s19 }
  0x11   : > { %1298 = vmatpush.xpose.msk.msra.mxu3 %vm347_vm0, %v346_v0  ;;  %v340_v6 = vld [vmem:[%s1527_s22 + $0x48] sm:$0xff]  ;;  %v339_v7 = vld [vmem:[%s1527_s22 + $0x40] sm:$0xff]  ;;  %v338_v8 = vld [vmem:[%s1527_s22 + $0x38] sm:$0xff] }
  0x12   : > { %v337_v9 = vld [vmem:[%s1527_s22 + $0x30] sm:$0xff]  ;;  %v336_v10 = vld [vmem:[%s1527_s22 + $0x28] sm:$0xff]  ;;  %v335_v11 = vld [vmem:[%s1527_s22 + $0x20] sm:$0xff] }
  0x13   : > { %v334_v12 = vld [vmem:[%s1527_s22 + $0x18] sm:$0xff]  ;;  %v333_v13 = vld [vmem:[%s1527_s22 + $0x10] sm:$0xff]  ;;  %v332_v14 = vld [vmem:[%s1527_s22 + $0x8] sm:$0xff] }
  0x14   : > { %1259 = vmatpush.xpose.msk.msra.mxu0 %vm347_vm0, %v345_v1  ;;  %1299 = vmatpush.xpose.msk.msra.mxu2 %vm347_vm0, %v345_v1  ;;  %v331_v15 = vld [vmem:[%s1527_s22] sm:$0xff]  ;;  %v320_v17 = vld [vmem:[%s1593_s25 + $0x28] sm:$0xff]  ;;  %v321_v20 = vld [vmem:[%s1593_s25 + $0x30] sm:$0xff] }
  0x15   : > { %1300 = vmatpush.xpose.msk.msra.mxu3 %vm347_vm0, %v345_v1  ;;  %v315_v16 = vld [vmem:[%s1593_s25] sm:$0xff]  ;;  %v316_v19 = vld [vmem:[%s1593_s25 + $0x8] sm:$0xff]  ;;  %v317_v22 = vld [vmem:[%s1593_s25 + $0x10] sm:$0xff] }
  0x16   : > { %v327_v18 = vld [vmem:[%s1593_s25 + $0x60] sm:$0xff]  ;;  %v328_v21 = vld [vmem:[%s1593_s25 + $0x68] sm:$0xff]  ;;  %v322_v23 = vld [vmem:[%s1593_s25 + $0x38] sm:$0xff] }
  0x17   : > { %v329_v24 = vld [vmem:[%s1593_s25 + $0x70] sm:$0xff]  ;;  %v318_v25 = vld [vmem:[%s1593_s25 + $0x18] sm:$0xff]  ;;  %v323_v26 = vld [vmem:[%s1593_s25 + $0x40] sm:$0xff] }
  0x18   : > { %1260 = vmatpush.xpose.msk.msra.mxu0 %vm347_vm0, %v344_v2  ;;  %1301 = vmatpush.xpose.msk.msra.mxu2 %vm347_vm0, %v344_v2  ;;  %v330_v27 = vld [vmem:[%s1593_s25 + $0x78] sm:$0xff]  ;;  %v319_v28 = vld [vmem:[%s1593_s25 + $0x20] sm:$0xff]  ;;  %v324_v29 = vld [vmem:[%s1593_s25 + $0x48] sm:$0xff] }
  0x19   : > { %1302 = vmatpush.xpose.msk.msra.mxu3 %vm347_vm0, %v344_v2  ;;  %v325_v30 = vld [vmem:[%s1593_s25 + $0x50] sm:$0xff]  ;;  %v326_v31 = vld [vmem:[%s1593_s25 + $0x58] sm:$0xff]  ;;  %v526_v32 = vld [vmem:[%s301_s29 + $0x8] sm:$0xff] }
  0x1a   : > { %v525_v33 = vld [vmem:[%s301_s29] sm:$0xff]  ;;  %vm530_vm1 = vnez %v526_v32  ;;  %v528_v40 = vld [vmem:[%s301_s29 + $0x18] sm:$0xff]  ;;  %v527_v45 = vld [vmem:[%s301_s29 + $0x10] sm:$0xff] }
  0x1b   : > { %vm529_vm2 = vnez %v525_v33  ;;  %v534_v35 = vsel %vm530_vm1, 16843009, %v1474_v34  ;;  %vm532_vm3 = vnez %v528_v40  ;;  %vm531_vm4 = vnez %v527_v45 }
  0x1c   : > { %1261 = vmatpush.xpose.msk.msra.mxu0 %vm347_vm0, %v343_v3  ;;  %1303 = vmatpush.xpose.msk.msra.mxu2 %vm347_vm0, %v343_v3  ;;  %v543_v36 = vunpack.c.2.s8 %v534_v35  ;;  %v1637_v37 = vsel %vm529_vm2, 16843009, %v1474_v34  ;;  %v544_v44 = vunpack.c.3.s8 %v534_v35  ;;  %v1644_v48 = vsel %vm532_vm3, 16843009, %v1474_v34 }
  0x1d   : > { %1304 = vmatpush.xpose.msk.msra.mxu3 %vm347_vm0, %v343_v3  ;;  %v539_v38 = vunpack.c.2.s8 %v1637_v37  ;;  %v540_v47 = vunpack.c.3.s8 %v1637_v37  ;;  %v550_v52 = vunpack.c.1.s8 %v1644_v48  ;;  %v1650_v53 = vsel %vm531_vm4, 16843009, %v1474_v34 }
  0x1e   : > { %v565_v39 = vpack.c.b16 %v543_v36, %v543_v36  ;;  %v567_v49 = vpack.c.b16 %v544_v44, %v544_v44  ;;  %v545_v58 = vunpack.c.0.s8 %v1650_v53  ;;  %v541_v62 = vunpack.c.0.s8 %v534_v35 }
  0x1f   : > { %v557_v41 = vpack.c.b16 %v539_v38, %v539_v38  ;;  %v559_v51 = vpack.c.b16 %v540_v47, %v540_v47  ;;  %v579_v61 = vpack.c.b16 %v550_v52, %v550_v52  ;;  %v537_v0 = vunpack.c.0.s8 %v1637_v37 }
  0x20   : > { %1262 = vmatpush.xpose.msk.msra.mxu0 %vm347_vm0, %v342_v4  ;;  %1305 = vmatpush.xpose.msk.msra.mxu2 %vm347_vm0, %v342_v4  ;;  %v566_v43 = vpack.c.b8 %v565_v39, %v565_v39  ;;  %v568_v56 = vpack.c.b8 %v567_v49, %v567_v49  ;;  %v569_v1 = vpack.c.b16 %v545_v58, %v545_v58  ;;  %v542_v2 = vunpack.c.1.s8 %v534_v35 }
  0x21   : > { %1306 = vmatpush.xpose.msk.msra.mxu3 %vm347_vm0, %v342_v4  ;;  %v558_v46 = vpack.c.b8 %v557_v41, %v557_v41  ;;  %v560_v60 = vpack.c.b8 %v559_v51, %v559_v51  ;;  %v546_v35 = vunpack.c.1.s8 %v1650_v53 }
  0x22   : > { %vm591_vm5 = vnez %v566_v43  ;;  %vm592_vm7 = vnez %v568_v56  ;;  %v548_v56 = vunpack.c.3.s8 %v1650_v53 }
  0x23   : > { %vm587_vm6 = vnez %v558_v46  ;;  %v607_v54 = vsel %vm591_vm5, 16843009, %v1474_v34  ;;  %vm588_vm9 = vnez %v560_v60  ;;  %v571_v46 = vpack.c.b16 %v546_v35, %v546_v35 }
  0x24   : > { %1263 = vmatpush.xpose.msk.msra.mxu0 %vm347_vm0, %v341_v5  ;;  %1307 = vmatpush.xpose.msk.msra.mxu2 %vm347_vm0, %v341_v5  ;;  %v603_v57 = vsel %vm587_vm6, 16843009, %v1474_v34  ;;  %v623_v59 = vunpack.c.0.s8 %v607_v54 }
  0x25   : > { %1308 = vmatpush.xpose.msk.msra.mxu3 %vm347_vm0, %v341_v5  ;;  %v619_v63 = vunpack.c.0.s8 %v603_v57  ;;  %v580_v5 = vpack.c.b8 %v579_v61, %v579_v61  ;;  %v551_v57 = vunpack.c.2.s8 %v1644_v48  ;;  %v572_v60 = vpack.c.b8 %v571_v46, %v571_v46  ;;  %v784_v46 = vld [vmem:[%s1690_s6 + $0x38] sm:$0xff] }
  0x26   : > { %vm639_vm8 = vcmp.ne.s32.totalorder %v623_v59, 0 }
  0x27   : > { %vm635_vm10 = vcmp.ne.s32.totalorder %v619_v63, 0  ;;  %vm598_vm11 = vnez %v580_v5  ;;  %v575_v63 = vpack.c.b16 %v548_v56, %v548_v56 }
  0x28   : > { %1264 = vmatpush.xpose.msk.msra.mxu0 %vm347_vm0, %v340_v6  ;;  %1309 = vmatpush.xpose.msk.msra.mxu2 %vm347_vm0, %v340_v6 }
  0x29   : > { %1310 = vmatpush.xpose.msk.msra.mxu3 %vm347_vm0, %v340_v6  ;;  %v561_v6 = vpack.c.b16 %v541_v62, %v541_v62 }
  0x2c   : > { %1265 = vmatpush.xpose.msk.msra.mxu0 %vm347_vm0, %v339_v7  ;;  %1311 = vmatpush.xpose.msk.msra.mxu2 %vm347_vm0, %v339_v7 }
  0x2d   : > { %1312 = vmatpush.xpose.msk.msra.mxu3 %vm347_vm0, %v339_v7 }
  0x30   : > { %1266 = vmatpush.xpose.msk.msra.mxu0 %vm347_vm0, %v338_v8  ;;  %1313 = vmatpush.xpose.msk.msra.mxu2 %vm347_vm0, %v338_v8 }
  0x31   : > { %1314 = vmatpush.xpose.msk.msra.mxu3 %vm347_vm0, %v338_v8  ;;  %v608_v8 = vsel %vm592_vm7, 16843009, %v1474_v34 }
  0x34   : > { %1267 = vmatpush.xpose.msk.msra.mxu0 %vm347_vm0, %v337_v9  ;;  %1315 = vmatpush.xpose.msk.msra.mxu2 %vm347_vm0, %v337_v9 }
  0x35   : > { %1316 = vmatpush.xpose.msk.msra.mxu3 %vm347_vm0, %v337_v9 }
  0x38   : > { %1268 = vmatpush.xpose.msk.msra.mxu0 %vm347_vm0, %v336_v10  ;;  %1317 = vmatpush.xpose.msk.msra.mxu2 %vm347_vm0, %v336_v10 }
  0x39   : > { %1318 = vmatpush.xpose.msk.msra.mxu3 %vm347_vm0, %v336_v10  ;;  %v553_v10 = vpack.c.b16 %v537_v0, %v537_v0  ;;  %v581_v0 = vpack.c.b16 %v551_v57, %v551_v57 }
  0x3c   : > { %1269 = vmatpush.xpose.msk.msra.mxu0 %vm347_vm0, %v335_v11  ;;  %1319 = vmatpush.xpose.msk.msra.mxu2 %vm347_vm0, %v335_v11 }
  0x3d   : > { %1320 = vmatpush.xpose.msk.msra.mxu3 %vm347_vm0, %v335_v11 }
  0x40   : > { %1270 = vmatpush.xpose.msk.msra.mxu0 %vm347_vm0, %v334_v12  ;;  %1321 = vmatpush.xpose.msk.msra.mxu2 %vm347_vm0, %v334_v12 }
  0x41   : > { %1322 = vmatpush.xpose.msk.msra.mxu3 %vm347_vm0, %v334_v12 }
  0x44   : > { %1271 = vmatpush.xpose.msk.msra.mxu0 %vm347_vm0, %v333_v13  ;;  %1323 = vmatpush.xpose.msk.msra.mxu2 %vm347_vm0, %v333_v13 }
  0x45   : > { %1324 = vmatpush.xpose.msk.msra.mxu3 %vm347_vm0, %v333_v13  ;;  %v604_v13 = vsel %vm588_vm9, 16843009, %v1474_v34  ;;  %vm1706_vm9 = vnez %v572_v60 }
  0x48   : > { %1272 = vmatpush.xpose.msk.msra.mxu0 %vm347_vm0, %v332_v14  ;;  %1325 = vmatpush.xpose.msk.msra.mxu2 %vm347_vm0, %v332_v14 }
  0x49   : > { %1326 = vmatpush.xpose.msk.msra.mxu3 %vm347_vm0, %v332_v14  ;;  %v570_v14 = vpack.c.b8 %v569_v1, %v569_v1  ;;  %v792_v1 = vld [vmem:[%s1690_s6 + $0x78] sm:$0xff] }
  0x4a   : > { %1329 = vmatpush.msra.mxu1 %v792_v1 }
  0x4b   : > { %vm593_vm12 = vnez %v570_v14  ;;  %v582_v14 = vpack.c.b8 %v581_v0, %v581_v0 }
  0x4c   : > { %1273 = vmatpush.xpose.msk.msra.mxu0 %vm347_vm0, %v331_v15  ;;  %1327 = vmatpush.xpose.msk.msra.mxu2 %vm347_vm0, %v331_v15 }
  0x4d   : > { %1328 = vmatpush.xpose.msk.msra.mxu3 %vm347_vm0, %v331_v15  ;;  %v624_v15 = vunpack.c.0.s8 %v608_v8  ;;  %v790_v8 = vld [vmem:[%s1690_s6 + $0x68] sm:$0xff] }
  0x4f   : > { %1274 = vmatmul.msk.f32.vlgmr.msra.gmra.mxu0 %vm347_vm0, %v315_v16  ;;  %1279 = vmatmul.msk.f32.vlgmr.msra.gmra.mxu2 %vm347_vm0, %v320_v17  ;;  %v562_v16 = vpack.c.b8 %v561_v6, %v561_v6  ;;  %v563_v17 = vpack.c.b16 %v542_v2, %v542_v2  ;;  %vm640_vm13 = vcmp.ne.s32.totalorder %v624_v15, 0  ;;  %v791_v2 = vld [vmem:[%s1690_s6 + $0x70] sm:$0xff]  ;;  %v552_v15 = vunpack.c.3.s8 %v1644_v48  ;;  %v780_v6 = vld [vmem:[%s1690_s6 + $0x18] sm:$0xff] }
  0x50   : > { %1286 = vmatmul.msk.f32.vlgmr.msra.gmra.mxu3 %vm347_vm0, %v327_v18  ;;  %793 = vmatpush.msrb.mxu0 %v792_v1 }
  0x51   : > { %vm589_vm14 = vnez %v562_v16  ;;  %1330 = vmatpush.msrb.mxu3 %v792_v1  ;;  %1331 = vmatpush.msra.mxu1 %v791_v2  ;;  %v789_v16 = vld [vmem:[%s1690_s6 + $0x60] sm:$0xff] }
  0x52   : > { %v605_v33 = vsel %vm589_vm14, 16843009, %v1474_v34  ;;  %794 = vmatpush.msrb.mxu0 %v791_v2 }
  0x53   : > { %v621_v40 = vunpack.c.0.s8 %v605_v33  ;;  %1332 = vmatpush.msrb.mxu3 %v791_v2  ;;  %1333 = vmatpush.msra.mxu1 %v790_v8 }
  0x54   : > { %795 = vmatpush.msrb.mxu0 %v790_v8 }
  0x55   : > { %vm637_vm5 = vcmp.ne.s32.totalorder %v621_v40, 0  ;;  %1334 = vmatpush.msrb.mxu3 %v790_v8  ;;  %1335 = vmatpush.msra.mxu1 %v789_v16  ;;  %v785_v40 = vld [vmem:[%s1690_s6 + $0x40] sm:$0xff]  ;;  %v778_v8 = vld [vmem:[%s1690_s6 + $0x8] sm:$0xff] }
  0x56   : > { %796 = vmatpush.msrb.mxu0 %v789_v16 }
  0x57   : > { %1275 = vmatmul.msk.f32.gmra.mxu0 %vm347_vm0, %v316_v19  ;;  %1280 = vmatmul.msk.f32.gmra.mxu2 %vm347_vm0, %v321_v20  ;;  %v620_v19 = vunpack.c.0.s8 %v604_v13  ;;  %v614_v20 = vsel %vm598_vm11, 16843009, %v1474_v34  ;;  %v576_v13 = vpack.c.b8 %v575_v63, %v575_v63 }
  0x58   : > { %1287 = vmatmul.msk.f32.gmra.mxu3 %vm347_vm0, %v328_v21 }
  0x59   : > { %vm636_vm15 = vcmp.ne.s32.totalorder %v620_v19, 0  ;;  %1336 = vmatpush.msrb.mxu3 %v789_v16  ;;  %vm596_vm11 = vnez %v576_v13 }
  0x5a   : > { %v612_v35 = vsel %vm596_vm11, 16843009, %v1474_v34 }
  0x5f   : > { %1276 = vmatmul.msk.f32.gmra.mxu0 %vm347_vm0, %v317_v22  ;;  %1281 = vmatmul.msk.f32.gmra.mxu2 %vm347_vm0, %v322_v23  ;;  %v554_v22 = vpack.c.b8 %v553_v10, %v553_v10  ;;  %v564_v23 = vpack.c.b8 %v563_v17, %v563_v17 }
  0x60   : > { %1288 = vmatmul.msk.f32.gmra.mxu3 %vm347_vm0, %v329_v24 }
  0x61   : > { %vm585_vm1 = vnez %v554_v22  ;;  %vm590_vm2 = vnez %v564_v23 }
  0x62   : > { %v601_v44 = vsel %vm585_vm1, 16843009, %v1474_v34  ;;  %v606_v45 = vsel %vm590_vm2, 16843009, %v1474_v34 }
  0x63   : > { %v617_v59 = vunpack.c.0.s8 %v601_v44  ;;  %v628_v44 = vunpack.c.0.s8 %v612_v35 }
  0x67   : > { %1277 = vmatmul.msk.f32.gmra.mxu0 %vm347_vm0, %v318_v25  ;;  %1282 = vmatmul.msk.f32.gmra.mxu2 %vm347_vm0, %v323_v26  ;;  %v538_v25 = vunpack.c.1.s8 %v1637_v37 }
  0x68   : > { %1289 = vmatmul.msk.f32.gmra.mxu3 %vm347_vm0, %v330_v27 }
  0x69   : > { %v555_v39 = vpack.c.b16 %v538_v25, %v538_v25  ;;  %v787_v25 = vld [vmem:[%s1690_s6 + $0x50] sm:$0xff] }
  0x6b   : > { %v556_v51 = vpack.c.b8 %v555_v39, %v555_v39 }
  0x6d   : > { %vm586_vm6 = vnez %v556_v51 }
  0x6e   : > { %v602_v10 = vsel %vm586_vm6, 16843009, %v1474_v34 }
  0x6f   : > { %1278 = vmatmul.msk.f32.gmra.mxu0 %vm347_vm0, %v319_v28  ;;  %1283 = vmatmul.msk.f32.gmra.mxu2 %vm347_vm0, %v324_v29  ;;  %v630_v28 = vunpack.c.0.s8 %v614_v20  ;;  %v609_v29 = vsel %vm593_vm12, 16843009, %v1474_v34  ;;  %v618_v19 = vunpack.c.0.s8 %v602_v10  ;;  %vm599_vm12 = vnez %v582_v14 }
  0x70   : > { %v625_v38 = vunpack.c.0.s8 %v609_v29 }
  0x71   : > { %vm646_vm3 = vcmp.ne.s32.totalorder %v630_v28, 0 }
  0x72   : > { %vm641_vm4 = vcmp.ne.s32.totalorder %v625_v38, 0 }
  0x77   : > { %1284 = vmatmul.msk.f32.gmra.mxu2 %vm347_vm0, %v325_v30  ;;  %v547_v30 = vunpack.c.2.s8 %v1650_v53  ;;  %v622_v53 = vunpack.c.0.s8 %v606_v45 }
  0x79   : > { %v573_v41 = vpack.c.b16 %v547_v30, %v547_v30  ;;  %v786_v30 = vld [vmem:[%s1690_s6 + $0x48] sm:$0xff] }
  0x7b   : > { %v574_v54 = vpack.c.b8 %v573_v41, %v573_v41 }
  0x7d   : > { %vm595_vm7 = vnez %v574_v54 }
  0x7f   : > { %1285 = vmatmul.msk.f32.gmra.mxu2 %vm347_vm0, %v326_v31 }
  0xcc   : > { %v1640_v42 = vpop.f32.mrf.mxu0 }
  0xd2   : > { %v1646_v50 = vpop.f32.mrf.mxu2 }
  0xd3   : > { %v1658_v4 = vpop.f32.mrf.mxu3 }
  0xd4   : > { %v1653_v55 = vpop.f32.mrf.mxu0  ;;  %v521_v0 = vmul.f32 0.125, %v1658_v4  ;;  %v781_v4 = vld [vmem:[%s1690_s6 + $0x20] sm:$0xff] }
  0xda   : > { %v479_v3 = vpop.f32.mrf.mxu2 }
  0xdb   : > { %v515_v7 = vmul.f32 0.125, %v479_v3  ;;  %v500_v27 = vpop.f32.mrf.mxu3  ;;  %v509_v3 = vmul.f32 0.125, %v1640_v42  ;;  %v611_v42 = vsel %vm595_vm7, 16843009, %v1474_v34 }
  0xdc   : > { %v467_v9 = vpop.f32.mrf.mxu0  ;;  %v522_v37 = vmul.f32 0.125, %v500_v27  ;;  %v627_v20 = vunpack.c.0.s8 %v611_v42 }
  0xdd   : > { %v511_v11 = vmul.f32 0.125, %v467_v9  ;;  %v1661_v12 = vsel %vm639_vm8, -1e+12, %v515_v7  ;;  %vm1702_vm8 = vcmp.ne.s32.totalorder %v617_v59, 0  ;;  %v514_v9 = vmul.f32 0.125, %v1646_v50  ;;  %v779_v7 = vld [vmem:[%s1690_s6 + $0x10] sm:$0xff] }
  0xde   : > { %677 = vmax.xlane.f32.xlu2 %v1661_v12  ;;  %v1682_v49 = vsel %vm646_vm3, -1e+12, %v522_v37  ;;  %v1719_v17 = vsel %vm1702_vm8, -1e+12, %v509_v3  ;;  %v610_v50 = vsel %vm1706_vm9, 16843009, %v1474_v34 }
  0xdf   : > { %v1665_v18 = vsel %vm635_vm10, -1e+12, %v511_v11  ;;  %v549_v11 = vunpack.c.0.s8 %v1644_v48  ;;  %vm638_vm10 = vcmp.ne.s32.totalorder %v622_v53, 0  ;;  %v626_v23 = vunpack.c.0.s8 %v610_v50  ;;  %v783_v3 = vld [vmem:[%s1690_s6 + $0x30] sm:$0xff] }
  0xe0   : > { %669 = vmax.xlane.f32.xlu0 %v1665_v18  ;;  %v1726_v48 = vsel %vm638_vm10, -1e+12, %v514_v9  ;;  %vm1735_vm14 = vcmp.ne.s32.totalorder %v627_v20, 0  ;;  %vm644_vm3 = vcmp.ne.s32.totalorder %v628_v44, 0  ;;  %v777_v9 = vld [vmem:[%s1690_s6] sm:$0xff] }
  0xe1   : > { %v577_v22 = vpack.c.b16 %v549_v11, %v549_v11 }
  0xe2   : > { %v482_v21 = vpop.f32.mrf.mxu2 }
  0xe3   : > { %v516_v24 = vmul.f32 0.125, %v482_v21  ;;  %v788_v21 = vld [vmem:[%s1690_s6 + $0x58] sm:$0xff]  ;;  %v503_v37 = vpop.f32.mrf.mxu3  ;;  %v578_v38 = vpack.c.b8 %v577_v22, %v577_v22 }
  0xe4   : > { %v470_v26 = vpop.f32.mrf.mxu0  ;;  %1337 = vmatpush.msra.mxu1 %v788_v21  ;;  %1338 = vmatpush.msrb.mxu3 %v788_v21  ;;  %v523_v51 = vmul.f32 0.125, %v503_v37 }
  0xe5   : > { %v512_v31 = vmul.f32 0.125, %v470_v26  ;;  %v1672_v32 = vsel %vm640_vm13, -1e+12, %v516_v24  ;;  %v583_v24 = vpack.c.b16 %v552_v15, %v552_v15  ;;  %v510_v26 = vmul.f32 0.125, %v1653_v55  ;;  %797 = vmatpush.msrb.mxu0 %v788_v21 }
  0xe6   : > { %679 = vmax.xlane.f32.xlu2 %v1672_v32  ;;  %vm1731_vm13 = vcmp.ne.s32.totalorder %v618_v19, 0  ;;  %v615_v55 = vsel %vm599_vm12, 16843009, %v1474_v34  ;;  %1339 = vmatpush.msra.mxu1 %v787_v25  ;;  %vm597_vm1 = vnez %v578_v38 }
  0xe7   : > { %v1677_v36 = vsel %vm636_vm15, -1e+12, %v512_v31  ;;  %1340 = vmatpush.msrb.mxu3 %v787_v25  ;;  %vm642_vm15 = vcmp.ne.s32.totalorder %v626_v23, 0  ;;  %v584_v39 = vpack.c.b8 %v583_v24, %v583_v24  ;;  %798 = vmatpush.msrb.mxu0 %v787_v25  ;;  %v1745_v41 = vsel %vm1731_vm13, -1e+12, %v510_v26 }
  0xe8   : > { %671 = vmax.xlane.f32.xlu0 %v1677_v36  ;;  %1341 = vmatpush.msra.mxu1 %v786_v30  ;;  %v631_v45 = vunpack.c.0.s8 %v615_v55  ;;  %v613_v56 = vsel %vm597_vm1, 16843009, %v1474_v34 }
  0xe9   : > { %1342 = vmatpush.msrb.mxu3 %v786_v30  ;;  %vm600_vm2 = vnez %v584_v39  ;;  %799 = vmatpush.msrb.mxu0 %v786_v30  ;;  %v629_v53 = vunpack.c.0.s8 %v613_v56 }
  0xea   : > { %v485_v43 = vpop.f32.mrf.mxu2  ;;  %1343 = vmatpush.msra.mxu1 %v785_v40  ;;  %v616_v57 = vsel %vm600_vm2, 16843009, %v1474_v34 }
  0xeb   : > { %v517_v47 = vmul.f32 0.125, %v485_v43  ;;  %1344 = vmatpush.msrb.mxu3 %v785_v40  ;;  %800 = vmatpush.msrb.mxu0 %v785_v40  ;;  %v506_v60 = vpop.f32.mrf.mxu3  ;;  %v632_v63 = vunpack.c.0.s8 %v616_v57 }
  0xec   : > { %v473_v52 = vpop.f32.mrf.mxu0  ;;  %1345 = vmatpush.msra.mxu1 %v784_v46  ;;  %v524_v1 = vmul.f32 0.125, %v506_v60 }
  0xed   : > { %v513_v58 = vmul.f32 0.125, %v473_v52  ;;  %v1693_v61 = vsel %vm641_vm4, -1e+12, %v517_v47  ;;  %1346 = vmatpush.msrb.mxu3 %v784_v46  ;;  %vm647_vm4 = vcmp.ne.s32.totalorder %v631_v45, 0  ;;  %801 = vmatpush.msrb.mxu0 %v784_v46  ;;  %vm648_vm6 = vcmp.ne.s32.totalorder %v632_v63, 0 }
  0xee   : > { %691 = vmax.xlane.f32.xlu2 %v1682_v49  ;;  %v1761_v59 = vsel %vm647_vm4, -1e+12, %v523_v51  ;;  %v1768_v2 = vsel %vm648_vm6, -1e+12, %v524_v1  ;;  %1347 = vmatpush.msra.mxu1 %v783_v3 }
  0xef   : > { %v1695_v62 = vsel %vm637_vm5, -1e+12, %v513_v58  ;;  %vm645_vm5 = vcmp.ne.s32.totalorder %v629_v53, 0  ;;  %1348 = vmatpush.msrb.mxu3 %v783_v3  ;;  %802 = vmatpush.msrb.mxu0 %v783_v3 }
  0xf0   : > { %681 = vmax.xlane.f32.xlu0 %v1693_v61  ;;  %673 = vmax.xlane.f32.xlu1 %v1695_v62  ;;  %v1766_v34 = vsel %vm645_vm5, -1e+12, %v521_v0 }
  0xf2   : > { %v488_v5 = vpop.f32.mrf.mxu2 }
  0xf3   : > { %v518_v31 = vmul.f32 0.125, %v488_v5  ;;  %v782_v5 = vld [vmem:[%s1690_s6 + $0x28] sm:$0xff] }
  0xf4   : > { %1349 = vmatpush.msra.mxu1 %v782_v5  ;;  %1350 = vmatpush.msrb.mxu3 %v782_v5 }
  0xf5   : > { %v1754_v47 = vsel %vm642_vm15, -1e+12, %v518_v31  ;;  %803 = vmatpush.msrb.mxu0 %v782_v5 }
  0xf6   : > { %665 = vmax.xlane.f32.xlu2 %v1719_v17  ;;  %1351 = vmatpush.msra.mxu1 %v781_v4 }
  0xf7   : > { %1352 = vmatpush.msrb.mxu3 %v781_v4  ;;  %804 = vmatpush.msrb.mxu0 %v781_v4 }
  0xf8   : > { %675 = vmax.xlane.f32.xlu1 %v1726_v48  ;;  %1353 = vmatpush.msra.mxu1 %v780_v6 }
  0xf9   : > { %1354 = vmatpush.msrb.mxu3 %v780_v6  ;;  %805 = vmatpush.msrb.mxu0 %v780_v6 }
  0xfa   : > { %v491_v27 = vpop.f32.mrf.mxu2  ;;  %1355 = vmatpush.msra.mxu1 %v779_v7 }
  0xfb   : > { %v519_v33 = vmul.f32 0.125, %v491_v27  ;;  %1356 = vmatpush.msrb.mxu3 %v779_v7  ;;  %806 = vmatpush.msrb.mxu0 %v779_v7 }
  0xfc   : > { %1357 = vmatpush.msra.mxu1 %v778_v8 }
  0xfd   : > { %v1749_v43 = vsel %vm1735_vm14, -1e+12, %v519_v33  ;;  %1358 = vmatpush.msrb.mxu3 %v778_v8  ;;  %807 = vmatpush.msrb.mxu0 %v778_v8 }
  0xfe   : > { %667 = vmax.xlane.f32.xlu2 %v1745_v41  ;;  %685 = vmax.xlane.f32.xlu0 %v1749_v43 }
  0xff   : > { %1359 = vmatpush.msra.mxu1 %v777_v9  ;;  %1360 = vmatpush.msrb.mxu3 %v777_v9 }
 0x100   : > { %683 = vmax.xlane.f32.xlu1 %v1754_v47  ;;  %808 = vmatpush.msrb.mxu0 %v777_v9 }
 0x102   : > { %v494_v52 = vpop.f32.mrf.mxu2 }
 0x103   : > { %v520_v54 = vmul.f32 0.125, %v494_v52 }
 0x105   : > { %v1759_v58 = vsel %vm644_vm3, -1e+12, %v520_v54 }
 0x106   : > { %687 = vmax.xlane.f32.xlu0 %v1759_v58 }
 0x108   : > { %693 = vmax.xlane.f32.xlu1 %v1761_v59 }
 0x10e   : > { %689 = vmax.xlane.f32.xlu0 %v1766_v34 }
 0x110   : > { %695 = vmax.xlane.f32.xlu1 %v1768_v2 }
 0x151   : > { %v678_v10 = vpop.xlane.xlu2 %677 }
 0x152   : > { %v703_v33 = vsub.f32 %v1661_v12, %v678_v10 }
 0x153   : > { %v670_v42 = vpop.xlane.xlu0 %669 }
 0x154   : > { %v699_v11 = vsub.f32 %v1665_v18, %v670_v42  ;;  %v725_v40 = vmul.f32 1.442695, %v703_v33 }
 0x156   : > { %v717_v13 = vmul.f32 1.442695, %v699_v11 }
 0x158   : > { %1386 = vpow2.f32 %v717_v13 }
 0x159   : > { %v680_v14 = vpop.xlane.xlu2 %679 }
 0x15a   : > { %v704_v44 = vsub.f32 %v1672_v32, %v680_v14 }
 0x15b   : > { %v672_v15 = vpop.xlane.xlu0 %671 }
 0x15c   : > { %v700_v16 = vsub.f32 %v1677_v36, %v672_v15  ;;  %v727_v46 = vmul.f32 1.442695, %v704_v44 }
 0x15e   : > { %v1387_v50 = vpop.eup %1386  ;;  %v719_v19 = vmul.f32 1.442695, %v700_v16 }
 0x15f   : > { %815 = vmatmul.f32.vlgmr.msra.gmra.mxu1 %v1387_v50 }
 0x160   : > { %1388 = vpow2.f32 %v719_v19 }
 0x161   : > { %v692_v20 = vpop.xlane.xlu2 %691 }
 0x162   : > { %v710_v21 = vsub.f32 %v1682_v49, %v692_v20 }
 0x163   : > { %v674_v22 = vpop.xlane.xlu1 %673  ;;  %v682_v26 = vpop.xlane.xlu0 %681 }
 0x164   : > { %v739_v23 = vmul.f32 1.442695, %v710_v21  ;;  %v701_v24 = vsub.f32 %v1695_v62, %v674_v22  ;;  %v705_v45 = vsub.f32 %v1693_v61, %v682_v26 }
 0x166   : > { %v1783_v25 = vpop.eup %1388  ;;  %1390 = vpow2.f32 %v739_v23  ;;  %v721_v18 = vmul.f32 1.442695, %v701_v24  ;;  %v729_v51 = vmul.f32 1.442695, %v705_v45 }
 0x167   : > { %818 = vmatmul.f32.gmra.mxu1 %v1783_v25 }
 0x168   : > { %1392 = vpow2.f32 %v721_v18 }
 0x169   : > { %v666_v36 = vpop.xlane.xlu2 %665 }
 0x16a   : > { %v697_v27 = vsub.f32 %v1719_v17, %v666_v36 }
 0x16b   : > { %v676_v28 = vpop.xlane.xlu1 %675 }
 0x16c   : > { %v1787_v29 = vpop.eup %1390  ;;  %v713_v30 = vmul.f32 1.442695, %v697_v27  ;;  %v702_v49 = vsub.f32 %v1726_v48, %v676_v28 }
 0x16d   : > { %848 = vmatmul.f32.vlgmr.msrb.gmra.mxu3 %v1787_v29 }
 0x16e   : > { %1394 = vpow2.f32 %v713_v30  ;;  %v723_v62 = vmul.f32 1.442695, %v702_v49  ;;  %v1393_v31 = vpop.eup %1392 }
 0x16f   : > { %821 = vmatmul.f32.gmra.mxu1 %v1393_v31 }
 0x170   : > { %1396 = vpow2.f32 %v723_v62 }
 0x171   : > { %v668_v35 = vpop.xlane.xlu2 %667  ;;  %v686_v55 = vpop.xlane.xlu0 %685 }
 0x172   : > { %v698_v37 = vsub.f32 %v1745_v41, %v668_v35  ;;  %v707_v4 = vsub.f32 %v1749_v43, %v686_v55 }
 0x173   : > { %v684_v17 = vpop.xlane.xlu1 %683 }
 0x174   : > { %v1395_v38 = vpop.eup %1394  ;;  %v715_v39 = vmul.f32 1.442695, %v698_v37 }
 0x175   : > { %809 = vmatmul.f32.vlgmr.msrb.gmra.mxu0 %v1395_v38  ;;  %745 = vadd.xlane.f32.xlu1 %v1395_v38 }
 0x176   : > { %v1397_v48 = vpop.eup %1396  ;;  %1398 = vpow2.f32 %v715_v39 }
 0x177   : > { %755 = vadd.xlane.f32.xlu0 %v1397_v48  ;;  %824 = vmatmul.f32.gmra.mxu1 %v1397_v48  ;;  %1400 = vpow2.f32 %v725_v40 }
 0x178   : > { %1402 = vpow2.f32 %v727_v46 }
 0x179   : > { %v688_v12 = vpop.xlane.xlu0 %687  ;;  %1404 = vpow2.f32 %v729_v51 }
 0x17a   : > { %v708_v32 = vsub.f32 %v1759_v58, %v688_v12  ;;  %v706_v58 = vsub.f32 %v1754_v47, %v684_v17 }
 0x17b   : > { %v694_v52 = vpop.xlane.xlu1 %693 }
 0x17c   : > { %v1399_v41 = vpop.eup %1398  ;;  %v711_v54 = vsub.f32 %v1761_v59, %v694_v52  ;;  %v735_v53 = vmul.f32 1.442695, %v708_v32  ;;  %v731_v9 = vmul.f32 1.442695, %v706_v58 }
 0x17d   : > { %747 = vadd.xlane.f32.xlu2 %v1399_v41  ;;  %812 = vmatmul.f32.gmra.mxu0 %v1399_v41  ;;  %v1401_v57 = vpop.eup %1400 }
 0x17e   : > { %v741_v56 = vmul.f32 1.442695, %v711_v54  ;;  %v1403_v0 = vpop.eup %1402 }
 0x17f   : > { %749 = vadd.xlane.f32.xlu0 %v1387_v50  ;;  %827 = vmatmul.f32.gmra.mxu1 %v1401_v57  ;;  %v1405_v3 = vpop.eup %1404 }
 0x180   : > { %1406 = vpow2.f32 %v741_v56 }
 0x181   : > { %v690_v61 = vpop.xlane.xlu0 %689 }
 0x182   : > { %v709_v60 = vsub.f32 %v1766_v34, %v690_v61  ;;  %v733_v34 = vmul.f32 1.442695, %v707_v4 }
 0x183   : > { %v696_v63 = vpop.xlane.xlu1 %695 }
 0x184   : > { %v737_v1 = vmul.f32 1.442695, %v709_v60  ;;  %v712_v59 = vsub.f32 %v1768_v2, %v696_v63 }
 0x185   : > { %759 = vadd.xlane.f32.xlu2 %v1403_v0 }
 0x186   : > { %v1407_v5 = vpop.eup %1406  ;;  %1408 = vpow2.f32 %v737_v1  ;;  %v743_v6 = vmul.f32 1.442695, %v712_v59 }
 0x187   : > { %1410 = vpow2.f32 %v735_v53  ;;  %761 = vadd.xlane.f32.xlu0 %v1405_v3  ;;  %851 = vmatmul.f32.gmra.mxu3 %v1407_v5 }
 0x188   : > { %1412 = vpow2.f32 %v743_v6  ;;  %830 = vmatmul.f32.gmra.mxu1 %v1403_v0 }
 0x189   : > { %1414 = vpow2.f32 %v733_v34 }
 0x18a   : > { %1416 = vpow2.f32 %v731_v9 }
 0x18c   : > { %v1409_v7 = vpop.eup %1408 }
 0x18d   : > { %v1411_v8 = vpop.eup %1410  ;;  %769 = vadd.xlane.f32.xlu1 %v1409_v7  ;;  %753 = vadd.xlane.f32.xlu2 %v1393_v31 }
 0x18e   : > { %v1413_v2 = vpop.eup %1412 }
 0x18f   : > { %767 = vadd.xlane.f32.xlu0 %v1411_v8  ;;  %854 = vmatmul.f32.gmra.mxu3 %v1413_v2  ;;  %v1415_v43 = vpop.eup %1414 }
 0x190   : > { %833 = vmatmul.f32.gmra.mxu1 %v1405_v3  ;;  %v1417_v10 = vpop.eup %1416 }
 0x195   : > { %757 = vadd.xlane.f32.xlu1 %v1401_v57  ;;  %765 = vadd.xlane.f32.xlu2 %v1415_v43 }
 0x197   : > { %773 = vadd.xlane.f32.xlu0 %v1407_v5 }
 0x198   : > { %836 = vmatmul.f32.gmra.mxu1 %v1417_v10 }
 0x19d   : > { %751 = vadd.xlane.f32.xlu1 %v1783_v25  ;;  %771 = vadd.xlane.f32.xlu2 %v1787_v29 }
 0x1a0   : > { %839 = vmatmul.f32.gmra.mxu1 %v1415_v43 }
 0x1a5   : > { %763 = vadd.xlane.f32.xlu1 %v1417_v10 }
 0x1a8   : > { %842 = vmatmul.f32.gmra.mxu1 %v1411_v8 }
 0x1ad   : > { %775 = vadd.xlane.f32.xlu1 %v1413_v2 }
 0x1b0   : > { %845 = vmatmul.f32.gmra.mxu1 %v1409_v7 }
 0x1dc   : > { %v1803_v47 = vpop.f32.mrf.mxu1 }
 0x1e4   : > { %v1805_v42 = vpop.f32.mrf.mxu1 }
 0x1e8   : > { %v746_v11 = vpop.xlane.xlu1 %745 }
 0x1e9   : > { %1418 = vrcp.f32 %v746_v11  ;;  %v867_v23 = vand.u32 2147483647, %v746_v11  ;;  %v869_v24 = vand.u32 2147483648, %v746_v11  ;;  %vm863_vm8 = vweird.f32 %v746_v11 }
 0x1ea   : > { %v756_v13 = vpop.xlane.xlu0 %755 }
 0x1eb   : > { %1420 = vrcp.f32 %v756_v13  ;;  %v937_v36 = vand.u32 2147483647, %v756_v13  ;;  %v939_v27 = vand.u32 2147483648, %v756_v13  ;;  %vm868_vm10 = vcmp.eq.f32.partialorder %v867_v23, 8.507059e+37 }
 0x1ec   : > { %v1807_v14 = vpop.f32.mrf.mxu1  ;;  %v870_v62 = vor.u32 1.1754944e-38, %v869_v24  ;;  %vm933_vm12 = vweird.f32 %v756_v13 }
 0x1ed   : > { %vm938_vm13 = vcmp.eq.f32.partialorder %v937_v36, 8.507059e+37  ;;  %v940_v38 = vor.u32 1.1754944e-38, %v939_v27 }
 0x1ef   : > { %v1419_v15 = vpop.eup %1418 }
 0x1f0   : > { %v859_v16 = vmul.f32 %v1419_v15, %v746_v11  ;;  %v748_v50 = vpop.xlane.xlu2 %747  ;;  %vm864_vm7 = vweird.f32 %v1419_v15 }
 0x1f1   : > { %v1421_v19 = vpop.eup %1420  ;;  %1422 = vrcp.f32 %v748_v50  ;;  %vm865_vm9 = vmor %vm863_vm8, %vm864_vm7  ;;  %v881_v44 = vand.u32 2147483647, %v748_v50  ;;  %v883_v51 = vand.u32 2147483648, %v748_v50  ;;  %vm877_vm2 = vweird.f32 %v748_v50 }
 0x1f2   : > { %v860_v20 = vsub.f32 1.0, %v859_v16  ;;  %v929_v21 = vmul.f32 %v1421_v19, %v756_v13  ;;  %v1809_v22 = vpop.xlane.xlu0 %749  ;;  %v810_v49 = vpop.f32.mrf.mxu0  ;;  %vm934_vm11 = vweird.f32 %v1421_v19 }
 0x1f3   : > { %1424 = vrcp.f32 %v1809_v22  ;;  %vm935_vm14 = vmor %vm933_vm12, %vm934_vm11  ;;  %v895_v12 = vand.u32 2147483647, %v1809_v22  ;;  %v897_v56 = vand.u32 2147483648, %v1809_v22  ;;  %vm891_vm3 = vweird.f32 %v1809_v22 }
 0x1f4   : > { %v930_v25 = vsub.f32 1.0, %v929_v21  ;;  %v861_v18 = vmul.f32 %v1419_v15, %v860_v20  ;;  %v825_v26 = vpop.f32.mrf.mxu1  ;;  %vm882_vm5 = vcmp.eq.f32.partialorder %v881_v44, 8.507059e+37  ;;  %v884_v63 = vor.u32 1.1754944e-38, %v883_v51 }
 0x1f5   : > { %vm1835_vm6 = vcmp.eq.f32.partialorder %v895_v12, 8.507059e+37  ;;  %v898_v58 = vor.u32 1.1754944e-38, %v897_v56 }
 0x1f6   : > { %v862_v28 = vadd.f32 %v1419_v15, %v861_v18  ;;  %v931_v29 = vmul.f32 %v1421_v19, %v930_v25 }
 0x1f7   : > { %v1423_v30 = vpop.eup %1422 }
 0x1f8   : > { %v873_v31 = vmul.f32 %v1423_v30, %v748_v50  ;;  %v866_v33 = vsel %vm865_vm9, %v1419_v15, %v862_v28  ;;  %v932_v35 = vadd.f32 %v1421_v19, %v931_v29  ;;  %v1812_v55 = vpop.xlane.xlu2 %759  ;;  %vm878_vm15 = vweird.f32 %v1423_v30 }
 0x1f9   : > { %v1425_v37 = vpop.eup %1424  ;;  %v871_v17 = vsel %vm868_vm10, %v870_v62, %v866_v33  ;;  %1426 = vrcp.f32 %v1812_v55  ;;  %vm879_vm4 = vmor %vm877_vm2, %vm878_vm15  ;;  %v965_v8 = vand.u32 2147483647, %v1812_v55  ;;  %v967_v15 = vand.u32 2147483648, %v1812_v55 }
 0x1fa   : > { %v874_v39 = vsub.f32 1.0, %v873_v31  ;;  %v1082_v40 = vmul.f32 %v871_v17, %v810_v49  ;;  %v887_v48 = vmul.f32 %v1425_v37, %v1809_v22  ;;  %v1823_v45 = vpop.xlane.xlu0 %761  ;;  %v936_v46 = vsel %vm935_vm14, %v1421_v19, %v932_v35  ;;  %v813_v34 = vpop.f32.mrf.mxu0 }
 0x1fb   : > { %1428 = vrcp.f32 %v1823_v45  ;;  %v941_v41 = vsel %vm938_vm13, %v940_v38, %v936_v46  ;;  %vm892_vm1 = vweird.f32 %v1425_v37  ;;  %vm961_vm9 = vweird.f32 %v1812_v55 }
 0x1fc   : > { %1098 = vst.msk [vmem:[%s1818_s9] sm:$0xff] %vm347_vm0, %v1082_v40  ;;  %v888_v52 = vsub.f32 1.0, %v887_v48  ;;  %v875_v54 = vmul.f32 %v1423_v30, %v874_v39  ;;  %v1087_v57 = vmul.f32 %v941_v41, %v825_v26  ;;  %v1830_v32 = vpop.f32.mrf.mxu1  ;;  %vm893_vm7 = vmor %vm891_vm3, %vm892_vm1  ;;  %vm966_vm10 = vcmp.eq.f32.partialorder %v965_v8, 8.507059e+37  ;;  %v1924_v8 = vpop.f32.mrf.mxu3 }
 0x1fd   : > { %v979_v24 = vand.u32 2147483647, %v1823_v45  ;;  %v981_v25 = vand.u32 2147483648, %v1823_v45  ;;  %vm975_vm13 = vweird.f32 %v1823_v45 }
 0x1fe   : > { %v889_v61 = vmul.f32 %v1425_v37, %v888_v52  ;;  %v876_v60 = vadd.f32 %v1423_v30, %v875_v54  ;;  %1103 = vst.msk [vmem:[%s1818_s9 + $0x28] sm:$0xff] %vm347_vm0, %v1087_v57 }
 0x1ff   : > { %v1427_v53 = vpop.eup %1426  ;;  %vm980_vm1 = vcmp.eq.f32.partialorder %v979_v24, 8.507059e+37 }
 0x200   : > { %v890_v0 = vadd.f32 %v1425_v37, %v889_v61  ;;  %v957_v59 = vmul.f32 %v1427_v53, %v1812_v55  ;;  %v880_v3 = vsel %vm879_vm4, %v1423_v30, %v876_v60  ;;  %v1840_v5 = vpop.xlane.xlu2 %753  ;;  %v1842_v4 = vpop.xlane.xlu1 %769  ;;  %vm962_vm8 = vweird.f32 %v1427_v53 }
 0x201   : > { %v1844_v6 = vpop.eup %1428  ;;  %v885_v7 = vsel %vm882_vm5, %v884_v63, %v880_v3  ;;  %1430 = vrcp.f32 %v1840_v5  ;;  %vm963_vm11 = vmor %vm961_vm9, %vm962_vm8  ;;  %v923_v26 = vand.u32 2147483647, %v1840_v5  ;;  %v925_v36 = vand.u32 2147483648, %v1840_v5 }
 0x202   : > { %v894_v9 = vsel %vm893_vm7, %v1425_v37, %v890_v0  ;;  %v958_v2 = vsub.f32 1.0, %v957_v59  ;;  %v1083_v43 = vmul.f32 %v885_v7, %v813_v34  ;;  %v971_v10 = vmul.f32 %v1844_v6, %v1823_v45  ;;  %v1851_v11 = vpop.xlane.xlu0 %767 }
 0x203   : > { %v899_v13 = vsel %vm1835_vm6, %v898_v58, %v894_v9  ;;  %1432 = vrcp.f32 %v1842_v4  ;;  %vm976_vm12 = vweird.f32 %v1844_v6  ;;  %v982_v37 = vor.u32 1.1754944e-38, %v981_v25 }
 0x204   : > { %v1084_v16 = vmul.f32 %v899_v13, %v1803_v47  ;;  %1099 = vst.msk [vmem:[%s1818_s9 + $0x8] sm:$0xff] %vm347_vm0, %v1083_v43  ;;  %v972_v50 = vsub.f32 1.0, %v971_v10  ;;  %v959_v19 = vmul.f32 %v1427_v53, %v958_v2  ;;  %1434 = vrcp.f32 %v1851_v11  ;;  %vm977_vm15 = vmor %vm975_vm13, %vm976_vm12 }
 0x205   : > { %v831_v20 = vpop.f32.mrf.mxu1  ;;  %v968_v47 = vor.u32 1.1754944e-38, %v967_v15  ;;  %vm919_vm2 = vweird.f32 %v1840_v5  ;;  %vm1889_vm3 = vcmp.eq.f32.partialorder %v923_v26, 8.507059e+37  ;;  %v926_v39 = vor.u32 1.1754944e-38, %v925_v36 }
 0x206   : > { %1100 = vst.msk [vmem:[%s1818_s9 + $0x10] sm:$0xff] %vm347_vm0, %v1084_v16  ;;  %v960_v21 = vadd.f32 %v1427_v53, %v959_v19  ;;  %v973_v22 = vmul.f32 %v1844_v6, %v972_v50  ;;  %v1021_v12 = vand.u32 2147483647, %v1851_v11  ;;  %v1023_v46 = vand.u32 2147483648, %v1851_v11 }
 0x207   : > { %v1431_v23 = vpop.eup %1430 }
 0x208   : > { %v915_v18 = vmul.f32 %v1431_v23, %v1840_v5  ;;  %v964_v27 = vsel %vm963_vm11, %v1427_v53, %v960_v21  ;;  %v1870_v28 = vpop.xlane.xlu2 %765  ;;  %v1872_v29 = vpop.xlane.xlu1 %757  ;;  %v974_v49 = vadd.f32 %v1844_v6, %v973_v22  ;;  %vm920_vm14 = vweird.f32 %v1431_v23 }
 0x209   : > { %v969_v30 = vsel %vm966_vm10, %v968_v47, %v964_v27  ;;  %1436 = vrcp.f32 %v1870_v28  ;;  %v1882_v35 = vpop.eup %1432  ;;  %vm921_vm4 = vmor %vm919_vm2, %vm920_vm14  ;;  %vm947_vm5 = vweird.f32 %v1872_v29  ;;  %v951_v41 = vand.u32 2147483647, %v1872_v29 }
 0x20a   : > { %v916_v62 = vsub.f32 1.0, %v915_v18  ;;  %v1089_v31 = vmul.f32 %v969_v30, %v831_v20  ;;  %1438 = vrcp.f32 %v1872_v29  ;;  %v1878_v33 = vpop.xlane.xlu0 %773  ;;  %v1886_v17 = vpop.eup %1434  ;;  %v978_v48 = vsel %vm977_vm15, %v1844_v6, %v974_v49 }
 0x20b   : > { %1440 = vrcp.f32 %v1878_v33  ;;  %v983_v45 = vsel %vm980_vm1, %v982_v37, %v978_v48  ;;  %v1901_v52 = vmul.f32 %v1882_v35, %v1842_v4  ;;  %v1013_v61 = vmul.f32 %v1886_v17, %v1851_v11 }
 0x20c   : > { %v917_v55 = vmul.f32 %v1431_v23, %v916_v62  ;;  %1105 = vst.msk [vmem:[%s1818_s9 + $0x38] sm:$0xff] %vm347_vm0, %v1089_v31  ;;  %v953_v53 = vand.u32 2147483648, %v1872_v29  ;;  %v1065_v5 = vand.u32 2147483648, %v1878_v33  ;;  %v1063_v7 = vand.u32 2147483647, %v1878_v33 }
 0x20d   : > { %v834_v40 = vpop.f32.mrf.mxu1  ;;  %v1028_v9 = vsub.f32 1.0, %v1901_v52  ;;  %vm1927_vm6 = vcmp.eq.f32.partialorder %v951_v41, 8.507059e+37  ;;  %vm1059_vm7 = vweird.f32 %v1878_v33  ;;  %v1014_v10 = vsub.f32 1.0, %v1013_v61 }
 0x20e   : > { %v918_v44 = vadd.f32 %v1431_v23, %v917_v55  ;;  %v1090_v54 = vmul.f32 %v983_v45, %v834_v40  ;;  %v1066_v16 = vor.u32 1.1754944e-38, %v1065_v5  ;;  %vm1003_vm9 = vweird.f32 %v1870_v28 }
 0x20f   : > { %v1896_v51 = vpop.eup %1436  ;;  %vm1938_vm11 = vcmp.eq.f32.partialorder %v1063_v7, 8.507059e+37  ;;  %v1007_v47 = vand.u32 2147483647, %v1870_v28  ;;  %v1009_v24 = vand.u32 2147483648, %v1870_v28  ;;  %v1015_v36 = vmul.f32 %v1886_v17, %v1014_v10 }
 0x210   : > { %v1439_v56 = vpop.eup %1438  ;;  %v922_v57 = vsel %vm921_vm4, %v1431_v23, %v918_v44  ;;  %v999_v60 = vmul.f32 %v1896_v51, %v1870_v28  ;;  %v1910_v63 = vpop.xlane.xlu2 %771  ;;  %1106 = vst.msk [vmem:[%s1818_s9 + $0x40] sm:$0xff] %vm347_vm0, %v1090_v54  ;;  %vm1004_vm12 = vweird.f32 %v1896_v51  ;;  %vm1017_vm15 = vweird.f32 %v1851_v11 }
 0x211   : > { %v1912_v0 = vpop.xlane.xlu1 %751  ;;  %v1441_v1 = vpop.eup %1440  ;;  %v927_v59 = vsel %vm1889_vm3, %v926_v39, %v922_v57  ;;  %v943_v3 = vmul.f32 %v1439_v56, %v1872_v29  ;;  %1442 = vrcp.f32 %v1910_v63  ;;  %vm948_vm8 = vweird.f32 %v1439_v56  ;;  %vm1005_vm3 = vmor %vm1003_vm9, %vm1004_vm12 }
 0x212   : > { %v1086_v6 = vmul.f32 %v927_v59, %v1807_v14  ;;  %v1000_v58 = vsub.f32 1.0, %v999_v60  ;;  %v1055_v34 = vmul.f32 %v1441_v1, %v1878_v33  ;;  %v954_v14 = vor.u32 1.1754944e-38, %v953_v53  ;;  %vm949_vm13 = vmor %vm947_vm5, %vm948_vm8  ;;  %v852_v39 = vpop.f32.mrf.mxu3 }
 0x213   : > { %v944_v2 = vsub.f32 1.0, %v943_v3  ;;  %1444 = vrcp.f32 %v1912_v0  ;;  %vm1060_vm10 = vweird.f32 %v1441_v1  ;;  %vm1045_vm14 = vweird.f32 %v1910_v63 }
 0x214   : > { %1102 = vst.msk [vmem:[%s1818_s9 + $0x20] sm:$0xff] %vm347_vm0, %v1086_v6  ;;  %v1056_v13 = vsub.f32 1.0, %v1055_v34  ;;  %v1001_v21 = vmul.f32 %v1896_v51, %v1000_v58  ;;  %vm1061_vm1 = vmor %vm1059_vm7, %vm1060_vm10  ;;  %v1049_v30 = vand.u32 2147483647, %v1910_v63  ;;  %v1051_v37 = vand.u32 2147483648, %v1910_v63 }
 0x215   : > { %v945_v15 = vmul.f32 %v1439_v56, %v944_v2  ;;  %v1935_v50 = vpop.f32.mrf.mxu1  ;;  %v909_v48 = vand.u32 2147483647, %v1912_v0  ;;  %v1010_v41 = vor.u32 1.1754944e-38, %v1009_v24  ;;  %vm1974_vm4 = vcmp.eq.f32.partialorder %v1021_v12, 8.507059e+37 }
 0x216   : > { %v1057_v19 = vmul.f32 %v1441_v1, %v1056_v13  ;;  %v1002_v29 = vadd.f32 %v1896_v51, %v1001_v21  ;;  %vm1008_vm5 = vcmp.eq.f32.partialorder %v1007_v47, 8.507059e+37  ;;  %v1016_v53 = vadd.f32 %v1886_v17, %v1015_v36 }
 0x217   : > { %v1443_v22 = vpop.eup %1442  ;;  %v946_v23 = vadd.f32 %v1439_v56, %v945_v15  ;;  %vm1050_vm9 = vcmp.eq.f32.partialorder %v1049_v30, 8.507059e+37  ;;  %vm905_vm10 = vweird.f32 %v1912_v0  ;;  %v1029_v10 = vmul.f32 %v1882_v35, %v1028_v9 }
 0x218   : > { %v1058_v25 = vadd.f32 %v1441_v1, %v1057_v19  ;;  %v1041_v18 = vmul.f32 %v1443_v22, %v1910_v63  ;;  %vm1046_vm2 = vweird.f32 %v1443_v22  ;;  %v1006_v61 = vsel %vm1005_vm3, %v1896_v51, %v1002_v29 }
 0x219   : > { %v1950_v26 = vpop.xlane.xlu1 %763  ;;  %v950_v27 = vsel %vm949_vm13, %v1439_v56, %v946_v23  ;;  %v1445_v49 = vpop.eup %1444  ;;  %v911_v56 = vand.u32 2147483648, %v1912_v0  ;;  %v1011_v60 = vsel %vm1008_vm5, %v1010_v41, %v1006_v61  ;;  %vm1047_vm7 = vmor %vm1045_vm14, %vm1046_vm2  ;;  %vm910_vm13 = vcmp.eq.f32.partialorder %v909_v48, 8.507059e+37 }
 0x21a   : > { %1446 = vrcp.f32 %v1950_v26  ;;  %v955_v62 = vsel %vm1927_vm6, %v954_v14, %v950_v27  ;;  %v1062_v31 = vsel %vm1061_vm1, %v1441_v1, %v1058_v25  ;;  %v1042_v55 = vsub.f32 1.0, %v1041_v18 }
 0x21b   : > { %v1088_v38 = vmul.f32 %v955_v62, %v1830_v32  ;;  %v1067_v33 = vsel %vm1938_vm11, %v1066_v16, %v1062_v31  ;;  %v901_v40 = vmul.f32 %v1445_v49, %v1912_v0  ;;  %vm1018_vm6 = vweird.f32 %v1886_v17 }
 0x21c   : > { %v1096_v44 = vmul.f32 %v1067_v33, %v852_v39  ;;  %v1043_v45 = vmul.f32 %v1443_v22, %v1042_v55  ;;  %v1052_v1 = vor.u32 1.1754944e-38, %v1051_v37  ;;  %vm906_vm8 = vweird.f32 %v1445_v49  ;;  %vm1997_vm11 = vmor %vm1017_vm15, %vm1018_vm6 }
 0x21d   : > { %1104 = vst.msk [vmem:[%s1818_s9 + $0x30] sm:$0xff] %vm347_vm0, %v1088_v38  ;;  %v902_v54 = vsub.f32 1.0, %v901_v40  ;;  %v840_v57 = vpop.f32.mrf.mxu1  ;;  %v912_v7 = vor.u32 1.1754944e-38, %v911_v56  ;;  %vm907_vm12 = vmor %vm905_vm10, %vm906_vm8  ;;  %v1020_v43 = vsel %vm1997_vm11, %v1886_v17, %v1016_v53  ;;  %v995_v13 = vand.u32 2147483648, %v1950_v26 }
 0x21e   : > { %1112 = vst.msk [vmem:[%s1818_s9 + $0x70] sm:$0xff] %vm347_vm0, %v1096_v44  ;;  %v1044_v28 = vadd.f32 %v1443_v22, %v1043_v45  ;;  %v1092_v3 = vmul.f32 %v1011_v60, %v840_v57  ;;  %v1024_v15 = vor.u32 1.1754944e-38, %v1023_v46  ;;  %v993_v19 = vand.u32 2147483647, %v1950_v26 }
 0x21f   : > { %v903_v59 = vmul.f32 %v1445_v49, %v902_v54  ;;  %vm989_vm15 = vweird.f32 %v1950_v26  ;;  %v1030_v46 = vadd.f32 %v1882_v35, %v1029_v10  ;;  %vm1032_vm1 = vweird.f32 %v1882_v35 }
 0x220   : > { %v1447_v12 = vpop.eup %1446  ;;  %v1048_v51 = vsel %vm1047_vm7, %v1443_v22, %v1044_v28  ;;  %1108 = vst.msk [vmem:[%s1818_s9 + $0x50] sm:$0xff] %vm347_vm0, %v1092_v3  ;;  %v1025_v9 = vsel %vm1974_vm4, %v1024_v15, %v1020_v43  ;;  %v996_v22 = vor.u32 1.1754944e-38, %v995_v13  ;;  %vm1031_vm3 = vweird.f32 %v1842_v4 }
 0x221   : > { %v985_v5 = vmul.f32 %v1447_v12, %v1950_v26  ;;  %v776_v6 = vpop.xlane.xlu1 %775  ;;  %v1053_v58 = vsel %vm1050_vm9, %v1052_v1, %v1048_v51  ;;  %v904_v34 = vadd.f32 %v1445_v49, %v903_v59  ;;  %vm990_vm14 = vweird.f32 %v1447_v12  ;;  %vm1033_vm4 = vmor %vm1031_vm3, %vm1032_vm1 }
 0x222   : > { %1448 = vrcp.f32 %v776_v6  ;;  %v1095_v0 = vmul.f32 %v1053_v58, %v1924_v8  ;;  %vm991_vm2 = vmor %vm989_vm15, %vm990_vm14  ;;  %vm994_vm5 = vcmp.eq.f32.partialorder %v993_v19, 8.507059e+37  ;;  %v1035_v24 = vand.u32 2147483647, %v1842_v4 }
 0x223   : > { %v986_v2 = vsub.f32 1.0, %v985_v5  ;;  %v908_v14 = vsel %vm907_vm12, %v1445_v49, %v904_v34  ;;  %v1034_v36 = vsel %vm1033_vm4, %v1882_v35, %v1030_v46  ;;  %v1079_v27 = vand.u32 2147483648, %v776_v6  ;;  %v855_v35 = vpop.f32.mrf.mxu3 }
 0x224   : > { %1111 = vst.msk [vmem:[%s1818_s9 + $0x68] sm:$0xff] %vm347_vm0, %v1095_v0  ;;  %v913_v8 = vsel %vm910_vm13, %v912_v7, %v908_v14  ;;  %v1077_v49 = vand.u32 2147483647, %v776_v6  ;;  %vm1036_vm7 = vcmp.eq.f32.partialorder %v1035_v24, 8.507059e+37  ;;  %vm1073_vm8 = vweird.f32 %v776_v6 }
 0x225   : > { %v987_v16 = vmul.f32 %v1447_v12, %v986_v2  ;;  %v1085_v17 = vmul.f32 %v913_v8, %v1805_v42  ;;  %v843_v52 = vpop.f32.mrf.mxu1  ;;  %v1037_v42 = vand.u32 2147483648, %v1842_v4 }
 0x226   : > { %v1093_v11 = vmul.f32 %v1025_v9, %v843_v52  ;;  %vm1078_vm10 = vcmp.eq.f32.partialorder %v1077_v49, 8.507059e+37 }
 0x227   : > { %v988_v20 = vadd.f32 %v1447_v12, %v987_v16  ;;  %1101 = vst.msk [vmem:[%s1818_s9 + $0x18] sm:$0xff] %vm347_vm0, %v1085_v17  ;;  %v1038_v30 = vor.u32 1.1754944e-38, %v1037_v42 }
 0x228   : > { %v1449_v21 = vpop.eup %1448  ;;  %1109 = vst.msk [vmem:[%s1818_s9 + $0x58] sm:$0xff] %vm347_vm0, %v1093_v11 }
 0x229   : > { %v992_v23 = vsel %vm991_vm2, %v1447_v12, %v988_v20  ;;  %v1069_v47 = vmul.f32 %v1449_v21, %v776_v6  ;;  %vm1074_vm6 = vweird.f32 %v1449_v21  ;;  %v1039_v31 = vsel %vm1036_vm7, %v1038_v30, %v1034_v36 }
 0x22a   : > { %v997_v25 = vsel %vm994_vm5, %v996_v22, %v992_v23  ;;  %vm1075_vm9 = vmor %vm1073_vm8, %vm1074_vm6 }
 0x22b   : > { %v1091_v18 = vmul.f32 %v997_v25, %v1935_v50  ;;  %v1070_v26 = vsub.f32 1.0, %v1069_v47  ;;  %v1080_v50 = vor.u32 1.1754944e-38, %v1079_v27 }
 0x22d   : > { %1107 = vst.msk [vmem:[%s1818_s9 + $0x48] sm:$0xff] %vm347_vm0, %v1091_v18  ;;  %v1071_v29 = vmul.f32 %v1449_v21, %v1070_v26  ;;  %v846_v62 = vpop.f32.mrf.mxu1 }
 0x22e   : > { %v1094_v55 = vmul.f32 %v1039_v31, %v846_v62 }
 0x22f   : > { %v1072_v4 = vadd.f32 %v1449_v21, %v1071_v29 }
 0x230   : > { %1110 = vst.msk [vmem:[%s1818_s9 + $0x60] sm:$0xff] %vm347_vm0, %v1094_v55 }
 0x231   : > { %v1076_v37 = vsel %vm1075_vm9, %v1449_v21, %v1072_v4 }
 0x232   : > { %v1081_v38 = vsel %vm1078_vm10, %v1080_v50, %v1076_v37 }
 0x233   : > { %v1097_v39 = vmul.f32 %v1081_v38, %v855_v35 }
 0x235   : > { %1113 = vst.msk [vmem:[%s1818_s9 + $0x78] sm:$0xff] %vm347_vm0, %v1097_v39 }
 0x236 PF: > { %s14_s17 = sadd.s32 1, %s1472_s17   ;;  %s2069_s15 = smov %s1468_s16 }
 0x237   : > { %p11_p5 = scmp.ge.s32.totalorder %s14_s17, 4   ;;  %s2070_s16 = smov %s2072_s18 }
 0x239   :  { %13 = sbr.rel (!%p11_p5) target bundleno = 2 (0x2), region = 75 }

</bundles_post_ra>
